<compile_context>
chip_gen: v7x
topology: tpu7x:2x2x1
jax: 0.10.0
libtpu: 0.0.40
codegen_flags: <defaults>
</compile_context>

<pallas_src>
import jax
import jax.numpy as jnp
from jax.experimental import pallas as pl
from jax.experimental.pallas import tpu as pltpu

TAU = 2.0
INV_TAU = 1.0 / TAU
V_TH = 1.0
BN_EPS = 1e-5

_VMEM_BUDGET = 40 * 1024 * 1024       # tile-choice budget (fits v7x 64 MiB VMEM)
_VMEM_LIMIT_CAP = 48 * 1024 * 1024


# ---------------------------------------------------------------------------
# Fused matmul + BN shift + LIF kernels
# ---------------------------------------------------------------------------
def _mm_bn_lif_kernel_1k(a_ref, w_ref, shift_ref, o_ref, v_ref):
    """Single-K-tile fast path.  Grid = (m, n, t); t sequential (membrane carry)."""
    t = pl.program_id(2)

    @pl.when(t == 0)
    def _init_membrane():
        v_ref[...] = jnp.zeros_like(v_ref)

    # bf16 x bf16 -> f32 on the MXU; BN shift added directly (scale folded into W).
    x = jnp.dot(a_ref[...], w_ref[...],
                preferred_element_type=jnp.float32) + shift_ref[...]
    v_prev = v_ref[...]
    v = v_prev + (x - v_prev) * INV_TAU            # LIF charge (decay_input)
    fire = v >= V_TH                               # one mask drives fire + reset
    o_ref[...] = fire.astype(o_ref.dtype)
    v_ref[...] = jnp.where(fire, 0.0, v)           # hard reset to 0


def _mm_bn_lif_kernel_multik(a_ref, w_ref, shift_ref, o_ref, acc_ref, v_ref):
    """General path.  Grid = (m, n, t, k); k is the matmul reduction axis."""
    t = pl.program_id(2)
    k = pl.program_id(3)

    @pl.when(jnp.logical_and(t == 0, k == 0))
    def _init_membrane():
        v_ref[...] = jnp.zeros_like(v_ref)

    @pl.when(k == 0)
    def _init_acc():
        # BN shift folded into the accumulator init (replaces the zero-fill pass).
        acc_ref[...] = jnp.broadcast_to(shift_ref[...], acc_ref.shape)

    acc_ref[...] += jnp.dot(a_ref[...], w_ref[...],
                            preferred_element_type=jnp.float32)

    @pl.when(k == pl.num_programs(3) - 1)
    def _lif():
        x = acc_ref[...]
        v_prev = v_ref[...]
        v = v_prev + (x - v_prev) * INV_TAU
        fire = v >= V_TH
        o_ref[...] = fire.astype(o_ref.dtype)
        v_ref[...] = jnp.where(fire, 0.0, v)


def matmul_bn_lif(a, w, shift, *, out_dtype, tm, tn, tk):
    """a: (T, M, K) — M % tm == 0, K % tk == 0.
       w: (K, N)   — BN scale already folded in, N % tn == 0.
       shift: (N,) f32 per-channel BN shift.
       Returns LIF spikes of shape (T, M, N) in `out_dtype`."""
    T, M, K = a.shape
    K2, N = w.shape
    assert K == K2 and M % tm == 0 and N % tn == 0 and K % tk == 0

    a = a.astype(jnp.bfloat16)
    w = w.astype(jnp.bfloat16)
    shift2 = shift.reshape(1, N).astype(jnp.float32)

    m_tiles, n_tiles, k_tiles = M // tm, N // tn, K // tk
    o_bytes = jnp.dtype(out_dtype).itemsize

    # A is re-streamed once per n-tile; W's block index is constant across m and t,
    # so it is fetched once in total.
    bytes_accessed = int(n_tiles * a.size * a.dtype.itemsize
                         + w.size * w.dtype.itemsize
                         + shift2.size * 4
                         + T * M * N * o_bytes)
    cost = pl.CostEstimate(flops=2 * T * M * N * K, transcendentals=0,
                           bytes_accessed=bytes_accessed)

    vmem_bytes = (2 * tm * tk * 2 + 2 * tk * tn * 2 + 2 * tm * tn * o_bytes
                  + 2 * tn * 4 + tm * tn * 4 * (1 if k_tiles == 1 else 2))
    vmem_limit = int(min(_VMEM_LIMIT_CAP, max(vmem_bytes + (4 << 20), 16 << 20)))

    if k_tiles == 1:
        grid = (m_tiles, n_tiles, T)
        kernel = _mm_bn_lif_kernel_1k
        in_specs = [
            pl.BlockSpec((None, tm, tk), lambda m, n, t: (t, m, 0)),
            pl.BlockSpec((tk, tn), lambda m, n, t: (0, n)),
            pl.BlockSpec((1, tn), lambda m, n, t: (0, n)),
        ]
        out_specs = pl.BlockSpec((None, tm, tn), lambda m, n, t: (t, m, n))
        scratch = [pltpu.VMEM((tm, tn), jnp.float32)]             # LIF membrane
        dims = ("parallel", "parallel", "arbitrary")
    else:
        grid = (m_tiles, n_tiles, T, k_tiles)
        kernel = _mm_bn_lif_kernel_multik
        in_specs = [
            pl.BlockSpec((None, tm, tk), lambda m, n, t, k: (t, m, k)),
            pl.BlockSpec((tk, tn), lambda m, n, t, k: (k, n)),
            pl.BlockSpec((1, tn), lambda m, n, t, k: (0, n)),
        ]
        out_specs = pl.BlockSpec((None, tm, tn), lambda m, n, t, k: (t, m, n))
        scratch = [pltpu.VMEM((tm, tn), jnp.float32),             # f32 accumulator
                   pltpu.VMEM((tm, tn), jnp.float32)]             # LIF membrane
        dims = ("parallel", "parallel", "arbitrary", "arbitrary")

    return pl.pallas_call(
        kernel,
        out_shape=jax.ShapeDtypeStruct((T, M, N), out_dtype),
        grid_spec=pltpu.PrefetchScalarGridSpec(
            num_scalar_prefetch=0,
            grid=grid,
            in_specs=in_specs,
            out_specs=out_specs,
            scratch_shapes=scratch,
        ),
        compiler_params=pltpu.CompilerParams(
            dimension_semantics=dims,
            vmem_limit_bytes=vmem_limit,
        ),
        cost_estimate=cost,
    )(a, w, shift2)


# ---------------------------------------------------------------------------
# Tiling helpers
# ---------------------------------------------------------------------------
def _round_up(x, m):
    return (x + m - 1) // m * m


def _choose_m_tiling(M, target=512, align=16):
    """tm (multiple of `align`) and M_pad = tm * m_tiles.  Guarantees >= 2 m-tiles
    whenever M allows so both v7x TensorCores get work on the parallel m axis."""
    M_a = _round_up(M, align)
    m_tiles = max(1, -(-M_a // target))
    if m_tiles == 1 and M_a > align:
        m_tiles = 2
    tm = _round_up(-(-M_a // m_tiles), align)
    return tm, tm * m_tiles


def _choose_n_tiling(N, full_panel_max=1024, tile=512):
    """Full output-channel panel (n_tiles == 1, weight stays resident) when small
    enough; otherwise 512-wide lane-dense tiles."""
    N128 = _round_up(N, 128)
    if N128 <= full_panel_max:
        return N128, N128
    return tile, _round_up(N, tile)


def _choose_k_tiling(K, tm, tn, o_bytes, budget=_VMEM_BUDGET):
    """Collapse the K grid axis (tk = K_pad, single reduction step) whenever the
    double-buffered working set fits the VMEM budget; otherwise tile K."""
    def est(tk, k_tiles):
        return (2 * tm * tk * 2 + 2 * tk * tn * 2 + 2 * tm * tn * o_bytes
                + 2 * tn * 4 + tm * tn * 4 * (1 if k_tiles == 1 else 2))
    K128 = _round_up(K, 128)
    if est(K128, 1) <= budget:
        return K128, K128
    tk = 2048
    while tk > 128 and est(tk, 2) > budget:
        tk -= 128
    return tk, _round_up(K, tk)


# ---------------------------------------------------------------------------
# Host-side glue: patch extraction, BN folding, parameters
# ---------------------------------------------------------------------------
def im2col_taps(x_nchw, k):
    """x: (N, C, H, W) -> (N, Hout, Wout, k*k*C); feature order (kh, kw, C).
    One NHWC transpose (before the k*k blowup) + one concat; no stack/transpose
    chain over the blown-up array."""
    N, C, H, W = x_nchw.shape
    Hout, Wout = H - k + 1, W - k + 1
    xh = jnp.transpose(x_nchw, (0, 2, 3, 1))                   # NHWC
    taps = [xh[:, kh:kh + Hout, kw:kw + Wout, :]
            for kh in range(k) for kw in range(k)]
    return jnp.concatenate(taps, axis=-1), Hout, Wout


def bn_affine(gamma, beta, mean, var):
    scale = gamma / jnp.sqrt(var + BN_EPS)
    shift = beta - mean * scale
    return scale, shift


def init_params(key, in_features, out_features, kernel_size, mlp_ratio=1.0):
    mid_features = int(out_features * mlp_ratio)
    k = kernel_size
    ks = jax.random.split(key, 8)
    return dict(
        kernel_size=k,
        in_features=in_features,
        mid_features=mid_features,
        out_features=out_features,
        # Conv2d(in, mid, k, bias=False) weight: (mid, in, k, k)
        w1=0.1 * jax.random.normal(ks[0], (mid_features, in_features, k, k), jnp.float32),
        bn1_gamma=1.0 + 0.1 * jax.random.normal(ks[1], (mid_features,), jnp.float32),
        bn1_beta=0.1 * jax.random.normal(ks[2], (mid_features,), jnp.float32),
        bn1_mean=0.05 * jax.random.normal(ks[3], (mid_features,), jnp.float32),
        bn1_var=1.0 + 0.1 * jax.random.uniform(ks[4], (mid_features,), jnp.float32),
        # Conv2d(mid, out, 1, bias=False) weight: (out, mid, 1, 1)
        w2=0.1 * jax.random.normal(ks[5], (out_features, mid_features, 1, 1), jnp.float32),
        bn2_gamma=1.0 + 0.1 * jax.random.normal(ks[6], (out_features,), jnp.float32),
        bn2_beta=0.1 * jax.random.normal(ks[7], (out_features,), jnp.float32),
        bn2_mean=jnp.zeros((out_features,), jnp.float32),
        bn2_var=jnp.ones((out_features,), jnp.float32),
    )


def conv_mlp_forward(x, params):
    """x: (T, B, C_in, H, W) f32 -> spikes (T, B, C_out, Hout, Wout) f32."""
    T, B, C, H, W = x.shape
    k = params["kernel_size"]
    C_mid = params["mid_features"]
    C_out = params["out_features"]
    # TODO(synk): adaptive_avg_pool2d branch (H or W < kernel_size) not implemented.
    assert H >= k and W >= k

    Hout, Wout = H - k + 1, W - k + 1
    M = B * Hout * Wout
    K1 = C * k * k

    # ---- conv patches (bf16), flattened to (T, M, K1) ----
    xb = x.astype(jnp.bfloat16).reshape(T * B, C, H, W)
    A, _, _ = im2col_taps(xb, k)
    A = A.reshape(T, M, K1)

    # ---- tiling / padding (lane-dense, >= 2 m-tiles when possible) ----
    tm, M_pad = _choose_m_tiling(M)
    tn1, N1_pad = _choose_n_tiling(C_mid)
    tk1, K1_pad = _choose_k_tiling(K1, tm, tn1, o_bytes=2)
    A = jnp.pad(A, ((0, 0), (0, M_pad - M), (0, K1_pad - K1)))

    # ---- layer 1: conv-k (as matmul) + BN + LIF fused ----
    s1, b1 = bn_affine(params["bn1_gamma"], params["bn1_beta"],
                       params["bn1_mean"], params["bn1_var"])
    # weight flattened in (kh, kw, C_in) order to match the patch layout
    w1_mat = jnp.transpose(params["w1"], (2, 3, 1, 0)).reshape(K1, C_mid) * s1[None, :]
    w1_mat = jnp.pad(w1_mat, ((0, K1_pad - K1), (0, N1_pad - C_mid)))
    b1_pad = jnp.pad(b1, (0, N1_pad - C_mid))
    s1_out = matmul_bn_lif(A, w1_mat, b1_pad, out_dtype=jnp.bfloat16,
                           tm=tm, tn=tn1, tk=tk1)              # (T, M_pad, N1_pad)

    # ---- layer 2: 1x1 conv + BN + LIF fused; consumes padded spikes directly ----
    s2, b2 = bn_affine(params["bn2_gamma"], params["bn2_beta"],
                       params["bn2_mean"], params["bn2_var"])
    K2 = N1_pad
    tn2, N2_pad = _choose_n_tiling(C_out)
    tk2, K2_pad = _choose_k_tiling(K2, tm, tn2, o_bytes=2)
    if K2_pad > K2:
        s1_out = jnp.pad(s1_out, ((0, 0), (0, 0), (0, K2_pad - K2)))
    w2_mat = params["w2"].reshape(C_out, C_mid).T * s2[None, :]
    w2_mat = jnp.pad(w2_mat, ((0, K2_pad - C_mid), (0, N2_pad - C_out)))
    b2_pad = jnp.pad(b2, (0, N2_pad - C_out))
    s2_out = matmul_bn_lif(s1_out, w2_mat, b2_pad, out_dtype=jnp.bfloat16,
                           tm=tm, tn=tn2, tk=tk2)              # (T, M_pad, N2_pad)

    # ---- strip padding; transpose in bf16; cast to f32 only at the very end ----
    out = s2_out[:, :M, :C_out]
    out = out.reshape(T, B, Hout, Wout, C_out).transpose(0, 1, 4, 2, 3)
    return out.astype(jnp.float32)


if __name__ == "__main__":
    key = jax.random.PRNGKey(0)
    k_x, k_p = jax.random.split(key)

    # small shapes consistent with the module's forward
    T, B, C_in, H, W = 2, 2, 4, 8, 8
    kernel_size = 3
    out_features = 16
    mlp_ratio = 1.0

    x = jax.random.normal(k_x, (T, B, C_in, H, W), jnp.float32)
    params = init_params(k_p, C_in, out_features, kernel_size, mlp_ratio)

    out = jax.block_until_ready(conv_mlp_forward(x, params))

    expected_shape = (T, B, out_features, H - kernel_size + 1, W - kernel_size + 1)
    assert out.shape == expected_shape, (out.shape, expected_shape)
    assert bool(jnp.all((out == 0.0) | (out == 1.0)))  # spikes are binary
    print("KERNEL_OK")
</pallas_src>

<mosaic_0001>
module attributes {stable_mosaic.version = 11 : i64} {
  func.func @_mm_bn_lif_kernel_1k(%arg0: i32, %arg1: i32, %arg2: i32, %arg3: memref<1x48x128xbf16, #tpu.memory_space<vmem>>, %arg4: memref<128x128xbf16, #tpu.memory_space<vmem>>, %arg5: memref<1x128xf32, #tpu.memory_space<vmem>>, %arg6: memref<1x48x128xbf16, #tpu.memory_space<vmem>>, %arg7: memref<48x128xf32, #tpu.memory_space<vmem>>) attributes {dimension_semantics = [#tpu.dimension_semantics<parallel>, #tpu.dimension_semantics<parallel>, #tpu.dimension_semantics<arbitrary>], iteration_bounds = array<i64: 2, 1, 2>, scalar_prefetch = 0 : i64, scratch_operands = 1 : i64, tpu.core_type = #tpu.core_type<tc>, window_params = [{transform_indices = @transform_0, window_bounds = array<i64: 1, 48, 128>}, {transform_indices = @transform_1, window_bounds = array<i64: 128, 128>}, {transform_indices = @transform_2, window_bounds = array<i64: 1, 128>}, {transform_indices = @transform_3, window_bounds = array<i64: 1, 48, 128>}]} {
    %c0_i32 = arith.constant 0 : i32
    %0 = arith.cmpi eq, %arg2, %c0_i32 : i32
    %1 = arith.extui %0 : i1 to i32
    %c0_i32_0 = arith.constant 0 : i32
    %2 = arith.cmpi ne, %1, %c0_i32_0 : i32
    scf.if %2 {
      %cst_17 = arith.constant 0.000000e+00 : f32
      %26 = vector.broadcast %cst_17 : f32 to vector<48x128xf32>
      %c0_18 = arith.constant 0 : index
      %c0_19 = arith.constant 0 : index
      %27 = vector.load %arg7[%c0_18, %c0_19] : memref<48x128xf32, #tpu.memory_space<vmem>>, vector<48x128xf32>
      tpu.vector_store %arg7[%c0_18, %c0_19], %26 {strides = array<i32>} : memref<48x128xf32, #tpu.memory_space<vmem>>, vector<48x128xf32>,
    } else {
    }
    %c0 = arith.constant 0 : index
    %c0_1 = arith.constant 0 : index
    %c0_2 = arith.constant 0 : index
    %3 = vector.load %arg3[%c0, %c0_1, %c0_2] : memref<1x48x128xbf16, #tpu.memory_space<vmem>>, vector<1x48x128xbf16>
    %4 = vector.shape_cast %3 : vector<1x48x128xbf16> to vector<48x128xbf16>
    %c0_3 = arith.constant 0 : index
    %c0_4 = arith.constant 0 : index
    %5 = vector.load %arg4[%c0_3, %c0_4] : memref<128x128xbf16, #tpu.memory_space<vmem>>, vector<128x128xbf16>
    %cst = arith.constant dense<0.000000e+00> : vector<48x128xf32>
    %6 = tpu.matmul %4, %5, %cst {dimension_numbers = #tpu.dot_dimension_numbers<[1], [0], [0], [1], [0, 0, 1, 1], [], []>} : vector<48x128xbf16>, vector<128x128xbf16>, vector<48x128xf32> -> vector<48x128xf32>
    %c0_5 = arith.constant 0 : index
    %c0_6 = arith.constant 0 : index
    %7 = vector.load %arg5[%c0_5, %c0_6] : memref<1x128xf32, #tpu.memory_space<vmem>>, vector<1x128xf32>
    %8 = vector.broadcast %7 : vector<1x128xf32> to vector<48x128xf32>
    %9 = arith.addf %6, %8 : vector<48x128xf32>
    %c0_7 = arith.constant 0 : index
    %c0_8 = arith.constant 0 : index
    %10 = vector.load %arg7[%c0_7, %c0_8] : memref<48x128xf32, #tpu.memory_space<vmem>>, vector<48x128xf32>
    %11 = arith.subf %9, %10 : vector<48x128xf32>
    %cst_9 = arith.constant 5.000000e-01 : f32
    %12 = vector.broadcast %cst_9 : f32 to vector<48x128xf32>
    %13 = arith.mulf %11, %12 : vector<48x128xf32>
    %14 = arith.addf %10, %13 : vector<48x128xf32>
    %cst_10 = arith.constant 1.000000e+00 : f32
    %15 = vector.broadcast %cst_10 : f32 to vector<48x128xf32>
    %16 = arith.cmpf oge, %14, %15 : vector<48x128xf32>
    %17 = arith.extui %16 : vector<48x128xi1> to vector<48x128xi32>
    %18 = arith.sitofp %17 : vector<48x128xi32> to vector<48x128xf32>
    %19 = arith.truncf %18 : vector<48x128xf32> to vector<48x128xbf16>
    %c0_11 = arith.constant 0 : index
    %c0_12 = arith.constant 0 : index
    %c0_13 = arith.constant 0 : index
    %20 = vector.load %arg6[%c0_11, %c0_12, %c0_13] : memref<1x48x128xbf16, #tpu.memory_space<vmem>>, vector<1x48x128xbf16>
    %21 = vector.shape_cast %20 : vector<1x48x128xbf16> to vector<48x128xbf16>
    %22 = vector.shape_cast %19 : vector<48x128xbf16> to vector<1x48x128xbf16>
    tpu.vector_store %arg6[%c0_11, %c0_12, %c0_13], %22 {strides = array<i32>} : memref<1x48x128xbf16, #tpu.memory_space<vmem>>, vector<1x48x128xbf16>,
    %cst_14 = arith.constant 0.000000e+00 : f32
    %23 = vector.broadcast %cst_14 : f32 to vector<48x128xf32>
    %24 = arith.select %16, %23, %14 : vector<48x128xi1>, vector<48x128xf32>
    %c0_15 = arith.constant 0 : index
    %c0_16 = arith.constant 0 : index
    %25 = vector.load %arg7[%c0_15, %c0_16] : memref<48x128xf32, #tpu.memory_space<vmem>>, vector<48x128xf32>
    tpu.vector_store %arg7[%c0_15, %c0_16], %24 {strides = array<i32>} : memref<48x128xf32, #tpu.memory_space<vmem>>, vector<48x128xf32>,
    return
  }
  func.func @transform_0(%arg0: i32, %arg1: i32, %arg2: i32) -> (i32, i32, i32) {
    %c0_i32 = arith.constant 0 : i32
    %c0_i32_0 = arith.constant 0 : i32
    return %arg2, %arg0, %c0_i32 : i32, i32, i32
  }
  func.func @transform_1(%arg0: i32, %arg1: i32, %arg2: i32) -> (i32, i32) {
    %c0_i32 = arith.constant 0 : i32
    %c0_i32_0 = arith.constant 0 : i32
    return %c0_i32, %arg1 : i32, i32
  }
  func.func @transform_2(%arg0: i32, %arg1: i32, %arg2: i32) -> (i32, i32) {
    %c0_i32 = arith.constant 0 : i32
    %c0_i32_0 = arith.constant 0 : i32
    return %c0_i32, %arg1 : i32, i32
  }
  func.func @transform_3(%arg0: i32, %arg1: i32, %arg2: i32) -> (i32, i32, i32) {
    %c0_i32 = arith.constant 0 : i32
    return %arg2, %arg0, %arg1 : i32, i32, i32
  }
}

</mosaic_0001>

<bundles_post_ra>
// kernel: tpu_custom_call.1
= control target key start
LH: loop header
LB: loop body
LE: loop exit
PB: predicated region body
PF: predicated region fallthrough
CT: control target
= control target key end

     0   :  { %s1332_s0 = inlined_call_operand.hbm [shape: bf16[2,96,128], index: 0, kind: input, shape index: {}]   ;;  %s1333_s1 = inlined_call_operand.hbm [shape: bf16[128,128], index: 1, kind: input, shape index: {}]   ;;  %s1334_s2 = inlined_call_operand.vmem [shape: f32[1,128], index: 2, kind: input, shape index: {}]   ;;  %s1335_s3 = inlined_call_operand.hbm [shape: bf16[2,96,128], index: 3, kind: output, shape index: {}]  }
   0x1   :  { %1345 = sst [smem:[#allocation15_spill]] %s1333_s1 }
   0x2   :  { %8 = vsyncpa [#allocation4], 0 }
   0x3   :  { %10 = vsyncpa [#allocation4 + $0x1], 0 }
   0x4   :  { %11 = vsyncpa [#allocation7], 0 }
   0x5   :  { %12 = vsyncpa [#allocation5], 0 }
   0x6   :  { %14 = vsyncpa [#allocation5 + $0x1], 0  ;;  %s1048_s12 = smov 0   ;;  %s1050_s13 = smov 0  }
   0x7   :  { %s1052_s14 = smov 0   ;;  %s1054_s15 = smov 0  }
   0x8   :  { %s1056_s16 = smov 0   ;;  %s1058_s17 = smov 0  }
   0x9   :  { %s1060_s18 = smov 0   ;;  %s1062_s19 = smov 0  }
   0xa LB: > { %s636_s20 = sadd.s32 4294967295, %s1016_s19   ;;  %s637_s21 = sadd.s32 4294967294, %s1016_s19   ;;  %s1016_s19 = sphi %s1062_s19, %s20_s19   ;;  %s1012_s18 = sphi %s1060_s18, %s1374_s18   ;;  %s1008_s17 = sphi %s1058_s17, %s1373_s17   ;;  %s1004_s16 = sphi %s1056_s16, %s1372_s16   ;;  %s1000_s15 = sphi %s1054_s15, %s1371_s15   ;;  %s996_s14 = sphi %s1052_s14, %s1370_s14   ;;  %s992_s13 = sphi %s1050_s13, %s1369_s13   ;;  %s988_s12 = sphi %s1048_s12, %s1368_s12  }
   0xb   : > { %p61_p0 = scmp.ne.s32.totalorder %s992_s13, %s988_s12  ;;  %p1092_p1 = scmp.eq.s32.totalorder %s636_s20, 0 }
   0xc   : > { %p1096_p2 = scmp.eq.s32.totalorder %s636_s20, 3  ;;  %p147_p3 = scmp.eq.s32.totalorder %s637_s21, 3 }
   0xd   : > { %s1346_s22 = scalar_select %p1092_p1, 1, 0 }
   0xe   : > { %s1347_s23 = scalar_select %p1096_p2, 1, 0 }
   0xf   : > { %p1102_p4 = por %p1092_p1, %p61_p0  ;;  %p638_p5 = scmp.ge.s32.totalorder %s1016_s19, 1 }
  0x10   : > { %p1107_p6 = por %p147_p3, %p61_p0  ;;  %p154_p7 = scmp.lt.s32.totalorder %s1016_s19, 5 }
  0x11   : > { %s1348_s24 = scalar_select %p1102_p4, 1, 0 }
  0x12   : > { %s1349_s25 = scalar_select %p1107_p6, 1, 0 }
  0x13   : > { %p1112_p8 = pnand %p638_p5, %p154_p7  ;;  %s1018_s27 = smov [#allocation6]  }
  0x14   : > { %1350 = sst [smem:[#allocation12_spill]] %s1349_s25  ;;  %s168_s28 = sshll.u32 %s1018_s27, 4  ;;  %s169_s28 = int_to_ptr.vmem [resolvable:$true] %s168_s28 }
  0x15   : > { %s1351_s26 = scalar_select %p1112_p8, 1, 0 }
  0x16   : > { %p757_p9 = pneg %p1112_p8  ;;  %s1353_s1 = sld [smem:[#allocation15_spill]] }
  0x18   : > { %p1120_p10 = pnand %p757_p9, %p1092_p1 }
  0x1a   : > { %p858_p12 = pneg %p1120_p10 }
  0x1c   : > { %s856_s5 = scalar_lea.hbm %s1353_s1, 1024 }
  0x1d   : > { %p857_p11 = scmp.ne.s32.totalorder %s1353_s1, %s856_s5  ;;  %p863_p3 = scmp.lt.u32.totalorder %s856_s5, %s1353_s1 }
  0x1f   : > { %p859_p13 = pnand %p858_p12, %p857_p11 }
  0x21   : > { %p860_p0 = pneg %p859_p13 }
  0x23   : > { %p865_p5 = pnand %p863_p3, %p860_p0 }
  0x25   : > { %868 = shalt.err (!%p865_p5)
}
  0x26   : > { %s869_s10 = scalar_lea.vmem %s169_s28, 1024  ;;  %p877_p1 = scmp.lt.s32.totalorder %s169_s28, %s169_s28 }
  0x27   : > { %p870_p7 = scmp.ne.s32.totalorder %s169_s28, %s869_s10  ;;  %p878_p4 = scmp.lt.s32.totalorder %s869_s10, %s869_s10 }
  0x29   : > { %p872_p9 = pnand %p870_p7, %p858_p12  ;;  %p879_p8 = por %p878_p4, %p877_p1 }
  0x2b   : > { %p873_p6 = pneg %p872_p9 }
  0x2d   : > { %p880_p2 = pnand %p879_p8, %p873_p6 }
  0x2f   : > { %883 = shalt.err (!%p880_p2)
}
  0x30   : > { %s1340_s11 = smov 64   ;;  %s1341_s20 = smov 4  }
  0x31   : > { %760 = dma.hbm_to_vmem [thread:$0]  (!%p1120_p10), %s1353_s1, 1024, %s169_s28, [#allocation7], %s1340_s11, %s1340_s11, %s1341_s20  }
  0x32   : > { %s32_s30 = sadd.s32 1, %s1008_s17  ;;  %s39_s4 = sadd.s32 1, %s1012_s18 }
  0x33   : > { %p33_p1 = scmp.ge.s32.totalorder %s32_s30, 2  ;;  %s48_s5 = sadd.s32 1, %s996_s14 }
  0x34   : > { %p55_p2 = scmp.ne.s32.totalorder %s996_s14, %s992_s13  ;;  %p56_p4 = scmp.eq.s32.totalorder %s1016_s19, 0 }
  0x35   : > { %s1376_s30 = smov (%p33_p1, %s32_s30), 0  ;;  %s1378_s4 = smov (!%p33_p1, %s39_s4), %s1012_s18 }
  0x36   : > { %1354 = sst [smem:[#allocation13_spill]] %s1376_s30  ;;  %s43_s29 = ssub.s32 %s1008_s17, %s1376_s30 }
  0x37   : > { %p41_p6 = scmp.ge.s32.totalorder %s1378_s4, 2  ;;  %p1355_p8 = scmp.ne.s32.totalorder %s1347_s23, 0 }
  0x38   : > { %p57_p10 = por %p56_p4, %p55_p2  ;;  %p770_p12 = scmp.lt.s32.totalorder %s1016_s19, 4 }
  0x39   : > { %p1156_p11 = por %p1355_p8, %p55_p2  ;;  %s1380_s4 = smov (%p41_p6, %s1378_s4), 0 }
  0x3a   : > { %1357 = sst [smem:[#allocation14_spill]] %s1380_s4  ;;  %s188_s28 = sand.u32 1, %s996_s14  }
  0x3b   : > { %s193_s7 = smul.u32 6, %s1012_s18  ;;  %s44_s8 = ssub.s32 %s1012_s18, %s1380_s4 }
  0x3c   : > { %s45_s9 = sor.u32 %s44_s8, %s43_s29  ;;  %s745_s10 = smul.u32 24, %s188_s28 }
  0x3d   : > { %p46_p13 = scmp.eq.s32.totalorder %s45_s9, 0  ;;  %s746_s21 = smul.u32 12, %s1008_s17 }
  0x3e   : > { %p1168_p0 = pnand %p770_p12, %p57_p10  ;;  %s192_s20 = scalar_lea.vmem [#allocation3], %s745_s10 }
  0x3f   : > { %s1173_s23 = scalar_select %p46_p13, %s996_s14, %s48_s5  }
  0x40   : > { %s198_s11 = sadd.s32 %s746_s21, %s193_s7  ;;  %s201_s1 = sshll.u32 %s192_s20, 4  ;;  %s1175_s1 = int_to_ptr.vmem [resolvable:$true] %s201_s1 }
  0x41   : > { %s642_s30 = sshll.u32 %s198_s11, 6  ;;  %s1182_s8 = scalar_lea.sflag [#allocation4], %s188_s28 }
  0x42   : > { %s1180_s29 = scalar_lea.hbm %s1332_s0, %s642_s30  ;;  %p886_p5 = pneg %p1168_p0 }
  0x43   : > { %s884_s9 = scalar_lea.hbm %s1180_s29, 384  ;;  %s889_s25 = scalar_lea.hbm %s1332_s0, 1536 }
  0x44   : > { %p885_p3 = scmp.ne.s32.totalorder %s1180_s29, %s884_s9  ;;  %p890_p1 = scmp.lt.u32.totalorder %s1180_s29, %s1332_s0 }
  0x45   : > { %p891_p2 = scmp.lt.u32.totalorder %s889_s25, %s884_s9  ;;  %p893_p6 = scmp.lt.u32.totalorder %s884_s9, %s1180_s29 }
  0x46   : > { %p887_p7 = pnand %p886_p5, %p885_p3 }
  0x47   : > { %p892_p4 = por %p891_p2, %p890_p1 }
  0x48   : > { %p888_p9 = pneg %p887_p7 }
  0x49   : > { %p894_p8 = por %p893_p6, %p892_p4 }
  0x4b   : > { %p895_p10 = pnand %p894_p8, %p888_p9 }
  0x4d   : > { %898 = shalt.err (!%p895_p10)
}
  0x4e   : > { %s899_s5 = scalar_lea.vmem %s1175_s1, 384  ;;  %s1021_s28 = smov [#allocation3]  }
  0x4f   : > { %p900_p12 = scmp.ne.s32.totalorder %s1175_s1, %s899_s5  ;;  %s904_s7 = sshll.u32 %s1021_s28, 4  ;;  %s905_s7 = int_to_ptr.vmem [resolvable:$false] %s904_s7 }
  0x50   : > { %s906_s10 = scalar_lea.vmem %s905_s7, 768  ;;  %p907_p7 = scmp.lt.s32.totalorder %s1175_s1, %s905_s7 }
  0x51   : > { %p902_p13 = pnand %p900_p12, %p886_p5  ;;  %p908_p1 = scmp.lt.s32.totalorder %s906_s10, %s899_s5 }
  0x53   : > { %p903_p3 = pneg %p902_p13  ;;  %p909_p2 = por %p908_p1, %p907_p7 }
  0x55   : > { %p910_p4 = pnand %p909_p2, %p903_p3 }
  0x57   : > { %913 = shalt.err (!%p910_p4)
}
  0x58   : > { %s1359_s21 = smov 4   ;;  %s1360_s9 = smov 64  }
  0x59   : > { %764 = dma.hbm_to_vmem [thread:$0]  (!%p1168_p0), %s1180_s29, 384, %s1175_s1, %s1182_s8, %s1360_s9, %s1360_s9, %s1359_s21  }
  0x5a   : > { %p1361_p5 = scmp.ne.s32.totalorder %s1351_s26, 0 }
  0x5b   : > { %s1216_s11 = sand.u32 (!%p1361_p5), 1, %s992_s13   ;;  %p1362_p9 = scmp.ne.s32.totalorder (!%p1361_p5), %s1348_s24, 0 }
  0x5c   : > { %213 = sbr.rel (%p1361_p5) target bundleno = 395 (0x18b), region = 32  ;;  %s216_s25 = scalar_lea.sflag (!%p1361_p5), [#allocation4], %s1216_s11 }
  0x5d   : > { %s747_s20 = smul.u32 (!%p1361_p5), 24, %s1216_s11 }
  0x5f   : > { %s1220_s30 = scalar_lea.vmem (!%p1361_p5), [#allocation3], %s747_s20 }
  0x63   : > { %975 = dma.done.wait (%p1362_p9), %s216_s25, 384  }
  0x64   : > { %977 = vsyncadd (%p1362_p9), %s216_s25, 4294966912  ;;  %p1363_p0 = scmp.ne.s32.totalorder %s1346_s22, 0 }
  0x66   : > { %979 = dma.done.wait (%p1363_p0), [#allocation7], 1024  }
  0x67   : > { %981 = vsyncadd (%p1363_p0), [#allocation7], 4294966272  ;;  %s1230_s1 = scalar_lea.vmem [#allocation8], %s747_s20  ;;  %p645_p6 = scmp.ne.s32.totalorder %s1000_s15, 0 }
  0x68   : > { %v1022_v0 = vmov (!%p645_p6), 0.0  }
  0x69   : > { %258 = sbr.rel (%p645_p6) target bundleno = 112 (0x70), region = 44  ;;  %259 = vst [vmem:[#allocation2] sm:$0xff] (!%p645_p6), %v1022_v0  ;;  %260 = vst [vmem:[#allocation2 + $0x8] sm:$0xff] (!%p645_p6), %v1022_v0 }
  0x6a   : > { %261 = vst [vmem:[#allocation2 + $0x10] sm:$0xff] (!%p645_p6), %v1022_v0  ;;  %262 = vst [vmem:[#allocation2 + $0x18] sm:$0xff] (!%p645_p6), %v1022_v0 }
  0x6b   : > { %263 = vst [vmem:[#allocation2 + $0x20] sm:$0xff] (!%p645_p6), %v1022_v0  ;;  %264 = vst [vmem:[#allocation2 + $0x28] sm:$0xff] (!%p645_p6), %v1022_v0 }
  0x70 PF: > { %v845_v1 = vld [vmem:[#allocation6] sm:$0xff]   ;;  %v1023_v2 = vmov 0.0   ;;  %v846_v3 = vld [vmem:[#allocation6 + $0x8] sm:$0xff]   ;;  %vm1024_vm0 = vmmov 0   ;;  %v847_v4 = vld [vmem:[#allocation6 + $0x10] sm:$0xff]   ;;  %s509_s26 = smul.u32 6, %s1004_s16 }
  0x71   : > { %729 = vmatprep.subr.bf16.mxu1 %v1023_v2  ;;  %701 = vmatprep.subr.bf16.mxu0 %v1023_v2  ;;  %v848_v5 = vld [vmem:[#allocation6 + $0x18] sm:$0xff]   ;;  %v849_v6 = vld [vmem:[#allocation6 + $0x20] sm:$0xff]   ;;  %v850_v7 = vld [vmem:[#allocation6 + $0x28] sm:$0xff]   ;;  %s748_s27 = smul.u32 12, %s1000_s15  ;;  %s518_s15 = sshll.u32 %s1230_s1, 4  ;;  %s1272_s15 = int_to_ptr.vmem [resolvable:$true] %s518_s15 }
  0x72   : > { %737 = vmatpush3.bf16.msra.mxu1 %v845_v1  ;;  %702 = vmatpush3.bf16.msra.mxu0 %v845_v1  ;;  %v851_v8 = vld [vmem:[#allocation6 + $0x30] sm:$0xff]   ;;  %v852_v9 = vld [vmem:[#allocation6 + $0x38] sm:$0xff]   ;;  %v646_v13 = vld [vmem:[%s1334_s2] ss:$0 sm:$0xff]  ;;  %s502_s28 = scalar_lea.sflag [#allocation5], %s1216_s11  ;;  %s914_s7 = scalar_lea.vmem %s1272_s15, 384 }
  0x73   : > { %730 = vmatprep.subr.bf16.mxu1 %v1023_v2  ;;  %703 = vmatprep.subr.bf16.mxu0 %v1023_v2  ;;  %v853_v10 = vld [vmem:[%s1220_s30 + $0x8] sm:$0xff]   ;;  %v854_v11 = vld [vmem:[%s1220_s30] sm:$0xff]   ;;  %v855_v12 = vld [vmem:[%s1220_s30 + $0x10] sm:$0xff]   ;;  %s515_s16 = sadd.s32 %s748_s27, %s509_s26  ;;  %p915_p8 = scmp.ne.s32.totalorder %s1272_s15, %s914_s7 }
  0x74   : > { %721 = vmatprep.mubr.msk.bf16.mxu1 %vm1024_vm0, %v1023_v2  ;;  %717 = vmatprep.mubr.msk.bf16.mxu0 %vm1024_vm0, %v1023_v2  ;;  %v419_v15 = vld [vmem:[#allocation2 + $0x10] sm:$0xff]  ;;  %v417_v17 = vld [vmem:[#allocation2] sm:$0xff]  ;;  %v420_v23 = vld [vmem:[#allocation2 + $0x18] sm:$0xff]  ;;  %s670_s29 = sshll.u32 %s515_s16, 6  ;;  %s1025_s10 = smov [#allocation8]  }
  0x75   : > { %v418_v25 = vld [vmem:[#allocation2 + $0x8] sm:$0xff]  ;;  %v421_v43 = vld [vmem:[#allocation2 + $0x20] sm:$0xff]  ;;  %s1277_s5 = scalar_lea.hbm %s1335_s3, %s670_s29  ;;  %p916_p10 = pnand %p915_p8, %p1156_p11 }
  0x76   : > { %738 = vmatpush3.bf16.msra.mxu1 %v846_v3  ;;  %704 = vmatpush3.bf16.msra.mxu0 %v846_v3  ;;  %v422_v45 = vld [vmem:[#allocation2 + $0x28] sm:$0xff]  ;;  %s918_s21 = sshll.u32 %s1025_s10, 4  ;;  %s919_s21 = int_to_ptr.vmem [resolvable:$false] %s918_s21 }
  0x77   : > { %731 = vmatprep.subr.bf16.mxu1 %v1023_v2  ;;  %705 = vmatprep.subr.bf16.mxu0 %v1023_v2  ;;  %p917_p12 = pneg %p916_p10  ;;  %s920_s9 = scalar_lea.vmem %s919_s21, 768 }
  0x78   : > { %p921_p13 = scmp.lt.s32.totalorder %s1272_s15, %s919_s21  ;;  %p922_p3 = scmp.lt.s32.totalorder %s920_s9, %s914_s7 }
  0x7a   : > { %739 = vmatpush3.bf16.msra.mxu1 %v847_v4  ;;  %706 = vmatpush3.bf16.msra.mxu0 %v847_v4  ;;  %p923_p7 = por %p922_p3, %p921_p13 }
  0x7b   : > { %732 = vmatprep.subr.bf16.mxu1 %v1023_v2  ;;  %707 = vmatprep.subr.bf16.mxu0 %v1023_v2 }
  0x7c   : > { %p924_p1 = pnand %p923_p7, %p917_p12 }
  0x7e   : > { %740 = vmatpush3.bf16.msra.mxu1 %v848_v5  ;;  %708 = vmatpush3.bf16.msra.mxu0 %v848_v5 }
  0x7f   : > { %733 = vmatprep.subr.bf16.mxu1 %v1023_v2  ;;  %709 = vmatprep.subr.bf16.mxu0 %v1023_v2 }
  0x82   : > { %741 = vmatpush3.bf16.msra.mxu1 %v849_v6  ;;  %710 = vmatpush3.bf16.msra.mxu0 %v849_v6 }
  0x83   : > { %734 = vmatprep.subr.bf16.mxu1 %v1023_v2  ;;  %711 = vmatprep.subr.bf16.mxu0 %v1023_v2 }
  0x86   : > { %742 = vmatpush3.bf16.msra.mxu1 %v850_v7  ;;  %712 = vmatpush3.bf16.msra.mxu0 %v850_v7 }
  0x87   : > { %735 = vmatprep.subr.bf16.mxu1 %v1023_v2  ;;  %713 = vmatprep.subr.bf16.mxu0 %v1023_v2 }
  0x8a   : > { %743 = vmatpush3.bf16.msra.mxu1 %v851_v8  ;;  %714 = vmatpush3.bf16.msra.mxu0 %v851_v8 }
  0x8b   : > { %736 = vmatprep.subr.bf16.mxu1 %v1023_v2  ;;  %715 = vmatprep.subr.bf16.mxu0 %v1023_v2 }
  0x8e   : > { %744 = vmatpush3.bf16.msra.mxu1 %v852_v9  ;;  %716 = vmatpush3.bf16.msra.mxu0 %v852_v9 }
  0x91   : > { %722 = vmatmul.mubr.bf16.vlgmr.msra.gmra.mrb[0].mxu1 %v853_v10  ;;  %718 = vmatmul.mubr.bf16.vlgmr.msra.gmra.mrb[0].mxu0 %v854_v11 }
  0x92   : > { %725 = vmatprep.mubr.msk.bf16.mxu1 %vm1024_vm0, %v1023_v2 }
  0x99   : > { %726 = vmatmul.mubr.bf16.gmra.mrb[4].mxu1 %v855_v12 }
 0x164   : > { %v402_v14 = vpop.f32.mrb[0].mxu1  ;;  %v394_v16 = vpop.f32.mrb[0].mxu0 }
 0x165   : > { %v403_v18 = vadd.f32 %v646_v13, %v402_v14  ;;  %v723_v19 = vpop.f32.mrb[1].mxu1  ;;  %v395_v20 = vadd.f32 %v646_v13, %v394_v16  ;;  %v719_v21 = vpop.f32.mrb[1].mxu0 }
 0x166   : > { %v405_v22 = vpop.f32.mrb[2].mxu1  ;;  %v397_v24 = vpop.f32.mrb[2].mxu0 }
 0x167   : > { %v425_v26 = vsub.f32 %v403_v18, %v419_v15  ;;  %v406_v27 = vadd.f32 %v646_v13, %v405_v22  ;;  %v724_v28 = vpop.f32.mrb[3].mxu1  ;;  %v423_v29 = vsub.f32 %v395_v20, %v417_v17  ;;  %v398_v30 = vadd.f32 %v646_v13, %v397_v24  ;;  %v720_v31 = vpop.f32.mrb[3].mxu0 }
 0x169   : > { %v431_v32 = vmul.f32 0.5, %v425_v26  ;;  %v426_v33 = vsub.f32 %v406_v27, %v420_v23  ;;  %v429_v34 = vmul.f32 0.5, %v423_v29  ;;  %v424_v35 = vsub.f32 %v398_v30, %v418_v25 }
 0x16b   : > { %v437_v36 = vadd.f32 %v431_v32, %v419_v15  ;;  %v432_v37 = vmul.f32 0.5, %v426_v33  ;;  %v435_v38 = vadd.f32 %v429_v34, %v417_v17  ;;  %v430_v39 = vmul.f32 0.5, %v424_v35 }
 0x16c   : > { %v410_v40 = vpop.f32.mrb[4].mxu1 }
 0x16d   : > { %vm443_vm1 = vcmp.ge.f32.partialorder %v437_v36, 1.0  ;;  %v438_v41 = vadd.f32 %v432_v37, %v420_v23  ;;  %vm441_vm2 = vcmp.ge.f32.partialorder %v435_v38, 1.0  ;;  %v436_v42 = vadd.f32 %v430_v39, %v418_v25  ;;  %v727_v44 = vpop.f32.mrb[5].mxu1 }
 0x16e   : > { %v660_v46 = vsel %vm443_vm1, 1.0, %v1023_v2  ;;  %v491_v47 = vsel %vm443_vm1, 0.0, %v437_v36  ;;  %v658_v48 = vsel %vm441_vm2, 1.0, %v1023_v2  ;;  %v489_v49 = vsel %vm441_vm2, 0.0, %v435_v38  ;;  %v413_v50 = vpop.f32.mrb[6].mxu1 }
 0x16f   : > { %497 = vst [vmem:[#allocation2 + $0x10] sm:$0xff] %v491_v47  ;;  %vm444_vm3 = vcmp.ge.f32.partialorder %v438_v41, 1.0  ;;  %495 = vst [vmem:[#allocation2] sm:$0xff] %v489_v49  ;;  %vm442_vm4 = vcmp.ge.f32.partialorder %v436_v42, 1.0  ;;  %v411_v51 = vadd.f32 %v646_v13, %v410_v40  ;;  %v414_v52 = vadd.f32 %v646_v13, %v413_v50  ;;  %v728_v53 = vpop.f32.mrb[7].mxu1 }
 0x170   : > { %v661_v54 = vsel %vm444_vm3, 1.0, %v1023_v2  ;;  %v492_v55 = vsel %vm444_vm3, 0.0, %v438_v41  ;;  %v659_v56 = vsel %vm442_vm4, 1.0, %v1023_v2  ;;  %v490_v57 = vsel %vm442_vm4, 0.0, %v436_v42 }
 0x171   : > { %v683_v58 = vpack.c.bf16 %v661_v54, %v660_v46  ;;  %498 = vst [vmem:[#allocation2 + $0x18] sm:$0xff] %v492_v55  ;;  %v680_v59 = vpack.c.bf16 %v659_v56, %v658_v48  ;;  %496 = vst [vmem:[#allocation2 + $0x8] sm:$0xff] %v490_v57  ;;  %v427_v60 = vsub.f32 %v411_v51, %v421_v43 }
 0x172   : > { %v428_v61 = vsub.f32 %v414_v52, %v422_v45 }
 0x173   : > { %688 = vst [vmem:[%s1230_s1 + $0x8] sm:$0xff] %v683_v58   ;;  %681 = vst [vmem:[%s1230_s1] sm:$0xff] %v680_v59   ;;  %v433_v62 = vmul.f32 0.5, %v427_v60 }
 0x174   : > { %v434_v63 = vmul.f32 0.5, %v428_v61 }
 0x175   : > { %v439_v0 = vadd.f32 %v433_v62, %v421_v43 }
 0x176   : > { %v440_v1 = vadd.f32 %v434_v63, %v422_v45 }
 0x177   : > { %vm445_vm5 = vcmp.ge.f32.partialorder %v439_v0, 1.0 }
 0x178   : > { %vm446_vm6 = vcmp.ge.f32.partialorder %v440_v1, 1.0  ;;  %v662_v3 = vsel %vm445_vm5, 1.0, %v1023_v2  ;;  %v493_v4 = vsel %vm445_vm5, 0.0, %v439_v0 }
 0x179   : > { %v663_v5 = vsel %vm446_vm6, 1.0, %v1023_v2  ;;  %v494_v6 = vsel %vm446_vm6, 0.0, %v440_v1  ;;  %499 = vst [vmem:[#allocation2 + $0x20] sm:$0xff] %v493_v4 }
 0x17a   : > { %v686_v7 = vpack.c.bf16 %v663_v5, %v662_v3  ;;  %500 = vst [vmem:[#allocation2 + $0x28] sm:$0xff] %v494_v6 }
 0x17c   : > { %689 = vst [vmem:[%s1230_s1 + $0x10] sm:$0xff] %v686_v7  }
 0x17d   : > { %927 = shalt.err (!%p924_p1)
}
 0x17e   : > { %s928_s20 = scalar_lea.hbm %s1277_s5, 384  ;;  %s932_s1 = scalar_lea.hbm %s1335_s3, 1536 }
 0x17f   : > { %p929_p2 = scmp.ne.s32.totalorder %s1277_s5, %s928_s20  ;;  %p933_p9 = scmp.lt.u32.totalorder %s1277_s5, %s1335_s3 }
 0x180   : > { %p934_p0 = scmp.lt.u32.totalorder %s932_s1, %s928_s20  ;;  %p936_p8 = scmp.lt.u32.totalorder %s928_s20, %s1277_s5 }
 0x181   : > { %p930_p4 = pnand %p929_p2, %p1156_p11 }
 0x182   : > { %p935_p6 = por %p934_p0, %p933_p9 }
 0x183   : > { %p931_p5 = pneg %p930_p4 }
 0x184   : > { %p937_p10 = por %p936_p8, %p935_p6 }
 0x186   : > { %p938_p12 = pnand %p937_p10, %p931_p5 }
 0x188   : > { %941 = shalt.err (!%p938_p12)
}
 0x189   : > { %s1026_s26 = smov 64   ;;  %s1027_s27 = smov 4  }
 0x18a   : > { %755 = dma.vmem_to_hbm [thread:$0]  (%p1156_p11), %s1272_s15, 384, %s1277_s5, %s502_s28, %s1026_s26, %s1026_s26, %s1027_s27  }
 0x18b PF: > { %s1364_s16 = sld [smem:[#allocation12_spill]]  ;;  %p772_p13 = scmp.ge.s32.totalorder %s1016_s19, 2 }
 0x18c   : > { %s533_s29 = sand.u32 1, %s988_s12  }
 0x18d   : > { %s534_s8 = scalar_lea.sflag [#allocation5], %s533_s29 }
 0x191   : > { %p1365_p3 = scmp.ne.s32.totalorder %s1364_s16, 0 }
 0x193   : > { %p766_p7 = pnand %p772_p13, %p1365_p3 }
 0x195   : > { %983 = dma.done.wait (!%p766_p7), %s534_s8, 384  }
 0x196   : > { %985 = vsyncadd (!%p766_p7), %s534_s8, 4294966912  ;;  %s20_s19 = sadd.s32 1, %s1016_s19   ;;  %s1366_s6 = sld [smem:[#allocation13_spill]] }
 0x197   : > { %p17_p1 = scmp.ge.s32.totalorder %s20_s19, 6   ;;  %s1367_s11 = sld [smem:[#allocation14_spill]] }
 0x198   : > { %s1368_s12 = smov %s992_s13  ;;  %s1369_s13 = smov %s996_s14 }
 0x199   : > { %s1370_s14 = smov %s1173_s23  ;;  %s1371_s15 = smov %s1008_s17 }
 0x19a   : > { %s1372_s16 = smov %s1012_s18  ;;  %19 = sbr.rel (!%p17_p1) target bundleno = 10 (0xa), region = 89 }
 0x19c   : > { %s1373_s17 = smov %s1366_s6 }
 0x19d   : > { %s1374_s18 = smov %s1367_s11 }
 0x1a1   :  { %539 = vsyncpa [#allocation4], 1 }
 0x1a2   :  { %541 = vsyncpa [#allocation4 + $0x1], 1 }
 0x1a3   :  { %542 = vsyncpa [#allocation7], 1 }
 0x1a4   :  { %543 = vsyncpa [#allocation5], 1 }
 0x1a5   :  { %545 = vsyncpa [#allocation5 + $0x1], 1 }

</bundles_post_ra>
